<compile_context>
chip_gen: v6e
topology: v6e:2x2x1
jax: 0.10.0
libtpu: 0.0.40
codegen_flags: <defaults>
</compile_context>

<pallas_src>
import functools

import jax
import jax.numpy as jnp
from jax import lax
from jax.experimental import pallas as pl
from jax.experimental.pallas import tpu as pltpu


@functools.lru_cache(maxsize=None)
def _vmem_limit():
    """Scoped-VMEM limit: ~3/4 of physical, capped at 100 MiB (v5e/v6e/v7x)."""
    try:
        cap = int(pltpu.get_tpu_info().vmem_capacity_bytes)
    except Exception:
        return None          # platform default
    return min(100 * 1024 * 1024, (cap * 3) // 4)


# ----------------------------------------------------------------------------
# Kernel: tiled per-channel sum / sum-of-squares for the *input* BatchNorm.
# Input is pre-packed to (M//k, k*C) so lanes are dense even for tiny C, and
# the row axis is tiled so the reduction streams at the HBM roofline.
# ----------------------------------------------------------------------------
def bn_stats_kernel(x_ref, sum_ref, sq_ref, acc_sum, acc_sq,
                    *, k, c, rows, tm, masked):
    i = pl.program_id(0)

    @pl.when(i == 0)
    def _init():
        acc_sum[...] = jnp.zeros_like(acc_sum)
        acc_sq[...] = jnp.zeros_like(acc_sq)

    x = x_ref[...].astype(jnp.float32)                     # (TM, k*C)
    if masked:
        r = lax.broadcasted_iota(jnp.int32, x.shape, 0) + i * tm
        x = jnp.where(r < rows, x, 0.0)
    acc_sum[...] += jnp.sum(x, axis=0, keepdims=True)
    acc_sq[...] += jnp.sum(x * x, axis=0, keepdims=True)

    # k-way lane fold + output store only on the last step (output block index
    # is constant along this 'arbitrary' axis, so only the last write matters).
    @pl.when(i == pl.num_programs(0) - 1)
    def _fold():
        s = acc_sum[...]
        q = acc_sq[...]
        width = k * c
        while width > c:                   # k is a power of two -> tree fold
            half = width // 2
            s = s[:, :half] + s[:, half:width]
            q = q[:, :half] + q[:, half:width]
            width = half
        sum_ref[...] = s[:, :c].reshape(1, 1, c)
        sq_ref[...] = q[:, :c].reshape(1, 1, c)


def bn_input_stats(x, *, max_lanes=512, max_rows=1024):
    """Per-channel sum / sum-of-squares of x (N,H,W,C) -> two (1,1,C) arrays."""
    n, h, w, c = x.shape
    m = n * h * w
    k = 1                                   # pack k rows per vreg row (pow2)
    while k * 2 * c <= max_lanes and m % (k * 2) == 0:
        k *= 2
    mp = m // k
    kc = k * c
    x2d = x.reshape(mp, kc)                 # free row-major reshape

    if mp <= max_rows:
        tm, masked = mp, False
    else:
        tm = 0
        t = (max_rows // 8) * 8
        while t >= 8:
            if mp % t == 0:
                tm = t
                break
            t -= 8
        if tm:
            masked = False
        else:                               # cdiv grid + in-kernel row mask
            tm, masked = (max_rows // 8) * 8, True
    grid = pl.cdiv(mp, tm)

    kernel = functools.partial(bn_stats_kernel, k=k, c=c, rows=mp, tm=tm,
                               masked=masked)
    return pl.pallas_call(
        kernel,
        out_shape=(jax.ShapeDtypeStruct((1, 1, c), jnp.float32),
                   jax.ShapeDtypeStruct((1, 1, c), jnp.float32)),
        grid=(grid,),
        in_specs=[pl.BlockSpec((tm, kc), lambda i: (i, 0))],
        out_specs=(pl.BlockSpec((1, 1, c), lambda i: (0, 0, 0)),
                   pl.BlockSpec((1, 1, c), lambda i: (0, 0, 0))),
        scratch_shapes=[pltpu.VMEM((1, kc), jnp.float32),
                        pltpu.VMEM((1, kc), jnp.float32)],
        compiler_params=pltpu.CompilerParams(
            dimension_semantics=("arbitrary",),
            vmem_limit_bytes=_vmem_limit()),
    )(x2d)


def _bn_fold(sum_ref, sq_ref, gamma_ref, beta_ref, inv_count, eps):
    """(G,1,C) partial sums -> per-channel (scale, shift), each (1, C)."""
    mean = jnp.sum(sum_ref[...], axis=0) * inv_count       # (1, C)
    ex2 = jnp.sum(sq_ref[...], axis=0) * inv_count         # (1, C)
    # Biased variance (PyTorch BatchNorm training-mode normalization).
    # TODO(synk): E[x^2]-E[x]^2 in f32 can cancel for large-mean channels; a
    #             shifted two-pass reduction would be more robust.
    var = jnp.maximum(ex2 - mean * mean, 0.0)
    scale = gamma_ref[0] * lax.rsqrt(var + eps)             # (1, C)
    shift = beta_ref[0] - mean * scale                      # (1, C)
    return scale, shift


# ----------------------------------------------------------------------------
# Kernel: fold(BN partials) + ReLU + 3x3 conv (padding=1) + bias, one batch
# element per grid step; optionally emits per-channel partial stats of its
# output and/or stores the output transposed (Cout, H*W) for lane density.
# ----------------------------------------------------------------------------
def conv3x3_kernel(sum_ref, sq_ref, gamma_ref, beta_ref, x_ref, w_ref, bias_ref,
                   *refs, inv_count, eps, use_im2col, emit_stats, transpose_out):
    h, w, cin = x_ref.shape[1], x_ref.shape[2], x_ref.shape[3]
    hp, wp = h + 2, w + 2
    cout = w_ref.shape[-1]

    if emit_stats:
        o_ref, osum_ref, osq_ref = refs[0], refs[1], refs[2]
        scratch = refs[3:]
    else:
        o_ref = refs[0]
        scratch = refs[1:]
    pad_ref = scratch[0]

    scale, shift = _bn_fold(sum_ref, sq_ref, gamma_ref, beta_ref, inv_count, eps)

    # Fused BN + ReLU written into the interior of the zero-padded scratch.
    x = x_ref[0].astype(jnp.float32)                                    # (H,W,Cin)
    y = jnp.maximum(x * scale.reshape(1, 1, cin) + shift.reshape(1, 1, cin), 0.0)
    pad_ref[1:hp - 1, 1:wp - 1, :] = y
    # Zero only the 1-pixel border frame each step (interior fully overwritten;
    # a once-only zero gated on program_id==0 is unsafe under megacore split).
    pad_ref[0:1, :, :] = jnp.zeros((1, wp, cin), pad_ref.dtype)
    pad_ref[hp - 1:hp, :, :] = jnp.zeros((1, wp, cin), pad_ref.dtype)
    pad_ref[1:hp - 1, 0:1, :] = jnp.zeros((h, 1, cin), pad_ref.dtype)
    pad_ref[1:hp - 1, wp - 1:wp, :] = jnp.zeros((h, 1, cin), pad_ref.dtype)

    mmt = w_ref.dtype
    if use_im2col:
        # Tiny-Cin path only (first conv): one MXU matmul with K = 9*Cin.
        # Lane-unaligned per-tap col writes are negligible at Cin <= 16; big
        # convs take the tap-wise path below instead.
        col_ref = scratch[1]
        for dy in range(3):
            for dx in range(3):
                t = dy * 3 + dx
                patch = pad_ref[dy:dy + h, dx:dx + w, :]                 # (H,W,Cin)
                col_ref[:, t * cin:(t + 1) * cin] = (
                    patch.reshape(h * w, cin).astype(mmt))
        acc = jnp.dot(col_ref[...], w_ref[...],
                      preferred_element_type=jnp.float32)                # (H*W,Cout)
    else:
        # Large-Cin path: 9 tap-wise matmuls (K = Cin each) accumulated in f32;
        # no materialized im2col buffer (VMEM + vst-slot win).
        acc = None
        for dy in range(3):
            for dx in range(3):
                t = dy * 3 + dx
                patch = pad_ref[dy:dy + h, dx:dx + w, :].reshape(h * w, cin)
                d = jnp.dot(patch.astype(mmt), w_ref[t * cin:(t + 1) * cin, :],
                            preferred_element_type=jnp.float32)
                acc = d if acc is None else acc + d

    out = acc + bias_ref[0]                                              # (H*W,Cout)
    out_q = out.astype(o_ref.dtype)

    if emit_stats:
        # Stats of the quantized values so the next BN normalizes exactly what
        # it reads back from HBM.
        of = out_q.astype(jnp.float32)
        osum_ref[...] = jnp.sum(of, axis=0, keepdims=True).reshape(1, 1, cout)
        osq_ref[...] = jnp.sum(of * of, axis=0, keepdims=True).reshape(1, 1, cout)

    if transpose_out:
        o_ref[0] = out_q.T                          # (Cout, H*W) lane-dense store
    else:
        o_ref[0] = out_q.reshape(h, w, cout)


def norm_relu_conv3x3(sums, sqs, gamma, beta, x, w9, bias, *, inv_count, eps,
                      mm_dtype, out_dtype, emit_stats=True, transpose_out=False):
    """sums/sqs: (G,1,Cin) BN partials; x: (N,H,W,Cin); w9: (9*Cin,Cout)."""
    n, h, w, cin = x.shape
    cout = w9.shape[-1]
    g = sums.shape[0]
    use_im2col = cin <= 16

    kernel = functools.partial(conv3x3_kernel, inv_count=inv_count, eps=eps,
                               use_im2col=use_im2col, emit_stats=emit_stats,
                               transpose_out=transpose_out)

    if transpose_out:
        out_shapes = [jax.ShapeDtypeStruct((n, cout, h * w), out_dtype)]
        out_specs = [pl.BlockSpec((1, cout, h * w), lambda i: (i, 0, 0))]
    else:
        out_shapes = [jax.ShapeDtypeStruct((n, h, w, cout), out_dtype)]
        out_specs = [pl.BlockSpec((1, h, w, cout), lambda i: (i, 0, 0, 0))]
    if emit_stats:
        out_shapes += [jax.ShapeDtypeStruct((n, 1, cout), jnp.float32)] * 2
        out_specs += [pl.BlockSpec((1, 1, cout), lambda i: (i, 0, 0))] * 2

    scratch = [pltpu.VMEM((h + 2, w + 2, cin), jnp.float32)]
    if use_im2col:
        scratch.append(pltpu.VMEM((h * w, 9 * cin), mm_dtype))

    single = len(out_shapes) == 1
    return pl.pallas_call(
        kernel,
        out_shape=out_shapes[0] if single else tuple(out_shapes),
        grid=(n,),
        in_specs=[
            pl.BlockSpec((g, 1, cin), lambda i: (0, 0, 0)),
            pl.BlockSpec((g, 1, cin), lambda i: (0, 0, 0)),
            pl.BlockSpec((1, 1, cin), lambda i: (0, 0, 0)),
            pl.BlockSpec((1, 1, cin), lambda i: (0, 0, 0)),
            pl.BlockSpec((1, h, w, cin), lambda i: (i, 0, 0, 0)),
            pl.BlockSpec((9 * cin, cout), lambda i: (0, 0)),
            pl.BlockSpec((1, 1, cout), lambda i: (0, 0, 0)),
        ],
        out_specs=out_specs[0] if single else tuple(out_specs),
        scratch_shapes=scratch,
        compiler_params=pltpu.CompilerParams(
            dimension_semantics=("parallel",),
            vmem_limit_bytes=_vmem_limit()),
    )(sums, sqs, gamma, beta, x, w9, bias)


# ----------------------------------------------------------------------------
# Kernel: fold(BN partials) + ReLU + 1x1 conv (no bias).  Grid = (batch,
# spatial row band); per-channel partial stats of the output are accumulated
# across the band axis in the (revisited) stats output blocks.
# ----------------------------------------------------------------------------
def conv1x1_kernel(sum_ref, sq_ref, gamma_ref, beta_ref, x_ref, w_ref,
                   o_ref, osum_ref, osq_ref, *, inv_count, eps):
    j = pl.program_id(1)
    th, wd, cin = x_ref.shape[1], x_ref.shape[2], x_ref.shape[3]
    cout = o_ref.shape[-1]

    scale, shift = _bn_fold(sum_ref, sq_ref, gamma_ref, beta_ref, inv_count, eps)

    x = x_ref[0].reshape(th * wd, cin).astype(jnp.float32)
    y = jnp.maximum(x * scale + shift, 0.0)                            # (T*W,Cin)
    out = jnp.dot(y.astype(w_ref.dtype), w_ref[...],
                  preferred_element_type=jnp.float32)                  # (T*W,Cout)
    out_q = out.astype(o_ref.dtype)
    of = out_q.astype(jnp.float32)

    @pl.when(j == 0)
    def _init():
        osum_ref[...] = jnp.zeros_like(osum_ref)
        osq_ref[...] = jnp.zeros_like(osq_ref)

    osum_ref[...] += jnp.sum(of, axis=0, keepdims=True).reshape(1, 1, cout)
    osq_ref[...] += jnp.sum(of * of, axis=0, keepdims=True).reshape(1, 1, cout)

    o_ref[0] = out_q.reshape(th, wd, cout)


def _band_rows(h, wd, cin):
    """Largest divisor of h giving ~<=2 MiB f32 row bands (>=2 bands if h>=16)."""
    cap = max(1, (1 << 21) // max(1, wd * cin * 4))
    if h >= 16:
        cap = min(cap, h // 2)
    best = 1
    for t in range(1, h + 1):
        if h % t == 0 and t <= cap:
            best = t
    return best


def norm_relu_conv1x1(sums, sqs, gamma, beta, x, w, *, inv_count, eps, out_dtype):
    """sums/sqs: (G,1,Cin) BN partials; x: (N,H,W,Cin); w: (Cin,Cout)."""
    n, h, wd, cin = x.shape
    cout = w.shape[-1]
    g = sums.shape[0]
    th = _band_rows(h, wd, cin)
    nb = h // th

    kernel = functools.partial(conv1x1_kernel, inv_count=inv_count, eps=eps)
    return pl.pallas_call(
        kernel,
        out_shape=(jax.ShapeDtypeStruct((n, h, wd, cout), out_dtype),
                   jax.ShapeDtypeStruct((n, 1, cout), jnp.float32),
                   jax.ShapeDtypeStruct((n, 1, cout), jnp.float32)),
        grid=(n, nb),
        in_specs=[
            pl.BlockSpec((g, 1, cin), lambda i, j: (0, 0, 0)),
            pl.BlockSpec((g, 1, cin), lambda i, j: (0, 0, 0)),
            pl.BlockSpec((1, 1, cin), lambda i, j: (0, 0, 0)),
            pl.BlockSpec((1, 1, cin), lambda i, j: (0, 0, 0)),
            pl.BlockSpec((1, th, wd, cin), lambda i, j: (i, j, 0, 0)),
            pl.BlockSpec((cin, cout), lambda i, j: (0, 0)),
        ],
        out_specs=(
            pl.BlockSpec((1, th, wd, cout), lambda i, j: (i, j, 0, 0)),
            pl.BlockSpec((1, 1, cout), lambda i, j: (i, 0, 0)),
            pl.BlockSpec((1, 1, cout), lambda i, j: (i, 0, 0)),
        ),
        compiler_params=pltpu.CompilerParams(
            dimension_semantics=("parallel", "arbitrary"),
            vmem_limit_bytes=_vmem_limit()),
    )(sums, sqs, gamma, beta, x, w)


# ----------------------------------------------------------------------------
# Forward pass
# ----------------------------------------------------------------------------
def _forward(x_nhwc, params, mm_dtype, eps):
    x = x_nhwc.astype(jnp.float32)
    n, h, w, cin = x.shape
    cmid = params["w_in"].shape[-1]
    cout = params["w_out"].shape[-1]
    inv_count = 1.0 / float(n * h * w)
    act_dtype = mm_dtype                 # bf16 intermediates on the bf16 path

    g1 = params["g1"].astype(jnp.float32).reshape(1, 1, cin)
    b1 = params["b1"].astype(jnp.float32).reshape(1, 1, cin)
    g2 = params["g2"].astype(jnp.float32).reshape(1, 1, cmid)
    b2 = params["b2"].astype(jnp.float32).reshape(1, 1, cmid)
    g3 = params["g3"].astype(jnp.float32).reshape(1, 1, cmid)
    b3 = params["b3"].astype(jnp.float32).reshape(1, 1, cmid)

    # HWIO (3,3,Cin,Cout) -> tap-major im2col/tap-wise weights (9*Cin, Cout).
    w_in = params["w_in"].reshape(9 * cin, cmid).astype(mm_dtype)
    w_mid = params["w_mid"].astype(mm_dtype)                      # (Cmid,Cmid)
    w_out = params["w_out"].reshape(9 * cmid, cout).astype(mm_dtype)
    zero_bias = jnp.zeros((1, 1, cmid), jnp.float32)
    out_bias = params["b_out"].astype(jnp.float32).reshape(1, 1, cout)

    s1, q1 = bn_input_stats(x)                                    # (1,1,Cin)
    h1, s2, q2 = norm_relu_conv3x3(s1, q1, g1, b1, x, w_in, zero_bias,
                                   inv_count=inv_count, eps=eps,
                                   mm_dtype=mm_dtype, out_dtype=act_dtype,
                                   emit_stats=True, transpose_out=False)
    h2, s3, q3 = norm_relu_conv1x1(s2, q2, g2, b2, h1, w_mid,
                                   inv_count=inv_count, eps=eps,
                                   out_dtype=act_dtype)
    h3 = norm_relu_conv3x3(s3, q3, g3, b3, h2, w_out, out_bias,
                           inv_count=inv_count, eps=eps,
                           mm_dtype=mm_dtype, out_dtype=jnp.float32,
                           emit_stats=False, transpose_out=True)  # (N,Cout,H*W)
    return h3.reshape(n, cout, h, w)                              # free reshape


@functools.partial(jax.jit, static_argnames=("mm_dtype", "eps"))
def nn_forward_pallas(x_nchw, params, mm_dtype=jnp.bfloat16, eps=1e-5):
    """NCHW in / NCHW out (matches the PyTorch module)."""
    x = jnp.transpose(x_nchw, (0, 2, 3, 1))
    return _forward(x, params, mm_dtype, eps)


# ----------------------------------------------------------------------------
# Pure-JAX reference (for verification)
# ----------------------------------------------------------------------------
def nn_forward_ref(x_nchw, params, eps=1e-5):
    x = jnp.transpose(x_nchw, (0, 2, 3, 1)).astype(jnp.float32)

    def bn_relu(h, g, b):
        mean = jnp.mean(h, axis=(0, 1, 2))
        var = jnp.var(h, axis=(0, 1, 2))
        return jnp.maximum((h - mean) / jnp.sqrt(var + eps) * g + b, 0.0)

    def conv(h, w_hwio, pad):
        return lax.conv_general_dilated(
            h, w_hwio, (1, 1), ((pad, pad), (pad, pad)),
            dimension_numbers=("NHWC", "HWIO", "NHWC"),
            precision=lax.Precision.HIGHEST)

    cmid = params["w_in"].shape[-1]
    h = bn_relu(x, params["g1"], params["b1"])
    h = conv(h, params["w_in"], 1)
    h = bn_relu(h, params["g2"], params["b2"])
    h = conv(h, params["w_mid"].reshape(1, 1, cmid, cmid), 0)
    h = bn_relu(h, params["g3"], params["b3"])
    h = conv(h, params["w_out"], 1) + params["b_out"]
    return jnp.transpose(h, (0, 3, 1, 2))


# ----------------------------------------------------------------------------
def make_params(key, cin, cmid, cout, zero_out=True):
    k1, k2, k3, k4 = jax.random.split(key, 4)
    p = {
        # BatchNorm2d affine params (default init: gamma=1, beta=0)
        "g1": jnp.ones((cin,), jnp.float32), "b1": jnp.zeros((cin,), jnp.float32),
        "g2": jnp.ones((cmid,), jnp.float32), "b2": jnp.zeros((cmid,), jnp.float32),
        "g3": jnp.ones((cmid,), jnp.float32), "b3": jnp.zeros((cmid,), jnp.float32),
        # Conv weights (HWIO); module init: N(0, 0.05) for in/mid, zeros for out
        "w_in": 0.05 * jax.random.normal(k1, (3, 3, cin, cmid), jnp.float32),
        "w_mid": 0.05 * jax.random.normal(k2, (cmid, cmid), jnp.float32),
        "w_out": jnp.zeros((3, 3, cmid, cout), jnp.float32),
        "b_out": jnp.zeros((cout,), jnp.float32),
    }
    if not zero_out:  # self-test variant with nontrivial last layer
        p["w_out"] = 0.05 * jax.random.normal(k3, (3, 3, cmid, cout), jnp.float32)
        p["b_out"] = 0.1 * jax.random.normal(k4, (cout,), jnp.float32)
    return p


if __name__ == "__main__":
    key = jax.random.PRNGKey(0)
    kx, kp = jax.random.split(key)

    N, Cin, Cmid, Cout, H, W = 2, 4, 32, 8, 16, 16
    x = jax.random.normal(kx, (N, Cin, H, W), jnp.float32)

    # --- unit check of the streaming BN-stats reduction (forces multi-step grid)
    xh = jnp.transpose(x, (0, 2, 3, 1))
    s_k, q_k = jax.block_until_ready(bn_input_stats(xh, max_lanes=8, max_rows=16))
    s_r = jnp.sum(xh, axis=(0, 1, 2))
    q_r = jnp.sum(xh * xh, axis=(0, 1, 2))
    assert jnp.allclose(s_k.reshape(-1), s_r, rtol=1e-4, atol=1e-3)
    assert jnp.allclose(q_k.reshape(-1), q_r, rtol=1e-4, atol=1e-3)

    # --- correctness self-test against a pure-JAX reference (nonzero last layer)
    test_params = make_params(kp, Cin, Cmid, Cout, zero_out=False)
    out_ref = jax.block_until_ready(nn_forward_ref(x, test_params))

    # f32-MXU / f32-intermediate path: tight check.
    out_f32 = jax.block_until_ready(
        nn_forward_pallas(x, test_params, mm_dtype=jnp.float32))
    assert out_f32.shape == (N, Cout, H, W)
    assert jnp.allclose(out_f32, out_ref, rtol=1e-2, atol=1e-2), (
        float(jnp.max(jnp.abs(out_f32 - out_ref))))

    # bf16-MXU + bf16 intermediates (default throughput path): looser tolerance.
    out_bf16 = jax.block_until_ready(nn_forward_pallas(x, test_params))
    assert jnp.allclose(out_bf16, out_ref, rtol=1e-1, atol=1e-1), (
        float(jnp.max(jnp.abs(out_bf16 - out_ref))))

    # --- module-faithful parameters (Glow init: zero-initialized out_conv)
    params = make_params(kp, Cin, Cmid, Cout, zero_out=True)
    out = jax.block_until_ready(nn_forward_pallas(x, params))
    assert out.shape == (N, Cout, H, W)
    assert bool(jnp.all(jnp.isfinite(out)))

    print("KERNEL_OK")
</pallas_src>

<mosaic_0001>
module attributes {stable_mosaic.version = 11 : i64} {
  func.func @bn_stats_kernel(%arg0: i32, %arg1: memref<16x8xf32, #tpu.memory_space<vmem>>, %arg2: memref<1x1x4xf32, #tpu.memory_space<vmem>>, %arg3: memref<1x1x4xf32, #tpu.memory_space<vmem>>, %arg4: memref<1x8xf32, #tpu.memory_space<vmem>>, %arg5: memref<1x8xf32, #tpu.memory_space<vmem>>) attributes {dimension_semantics = [#tpu.dimension_semantics<arbitrary>], iteration_bounds = array<i64: 16>, scalar_prefetch = 0 : i64, scratch_operands = 2 : i64, tpu.core_type = #tpu.core_type<tc>, window_params = [{transform_indices = @transform_0, window_bounds = array<i64: 16, 8>}, {pipeline_mode = #tpu.pipeline_mode<synchronous>, transform_indices = @transform_1, window_bounds = array<i64: 1, 1, 4>}, {pipeline_mode = #tpu.pipeline_mode<synchronous>, transform_indices = @transform_2, window_bounds = array<i64: 1, 1, 4>}]} {
    %c0_i32 = arith.constant 0 : i32
    %0 = arith.cmpi eq, %arg0, %c0_i32 : i32
    %1 = arith.extui %0 : i1 to i32
    %c0_i32_0 = arith.constant 0 : i32
    %2 = arith.cmpi ne, %1, %c0_i32_0 : i32
    scf.if %2 {
      %cst_12 = arith.constant 0.000000e+00 : f32
      %18 = vector.broadcast %cst_12 : f32 to vector<1x8xf32>
      %c0_13 = arith.constant 0 : index
      %c0_14 = arith.constant 0 : index
      %19 = vector.load %arg4[%c0_13, %c0_14] : memref<1x8xf32, #tpu.memory_space<vmem>>, vector<1x8xf32>
      tpu.vector_store %arg4[%c0_13, %c0_14], %18 {strides = array<i32>} : memref<1x8xf32, #tpu.memory_space<vmem>>, vector<1x8xf32>,
      %cst_15 = arith.constant 0.000000e+00 : f32
      %20 = vector.broadcast %cst_15 : f32 to vector<1x8xf32>
      %c0_16 = arith.constant 0 : index
      %c0_17 = arith.constant 0 : index
      %21 = vector.load %arg5[%c0_16, %c0_17] : memref<1x8xf32, #tpu.memory_space<vmem>>, vector<1x8xf32>
      tpu.vector_store %arg5[%c0_16, %c0_17], %20 {strides = array<i32>} : memref<1x8xf32, #tpu.memory_space<vmem>>, vector<1x8xf32>,
    } else {
    }
    %c0 = arith.constant 0 : index
    %c0_1 = arith.constant 0 : index
    %3 = vector.load %arg1[%c0, %c0_1] : memref<16x8xf32, #tpu.memory_space<vmem>>, vector<16x8xf32>
    %c0_2 = arith.constant 0 : index
    %c0_3 = arith.constant 0 : index
    %4 = vector.load %arg4[%c0_2, %c0_3] : memref<1x8xf32, #tpu.memory_space<vmem>>, vector<1x8xf32>
    %cst = arith.constant dense<0.000000e+00> : vector<8xf32>
    %5 = vector.multi_reduction <add>, %3, %cst [0] : vector<16x8xf32> to vector<8xf32>
    %6 = vector.shape_cast %5 : vector<8xf32> to vector<1x8xf32>
    %7 = arith.addf %4, %6 : vector<1x8xf32>
    %c0_4 = arith.constant 0 : index
    %c0_5 = arith.constant 0 : index
    %8 = vector.load %arg4[%c0_4, %c0_5] : memref<1x8xf32, #tpu.memory_space<vmem>>, vector<1x8xf32>
    tpu.vector_store %arg4[%c0_4, %c0_5], %7 {strides = array<i32>} : memref<1x8xf32, #tpu.memory_space<vmem>>, vector<1x8xf32>,
    %c0_6 = arith.constant 0 : index
    %c0_7 = arith.constant 0 : index
    %9 = vector.load %arg5[%c0_6, %c0_7] : memref<1x8xf32, #tpu.memory_space<vmem>>, vector<1x8xf32>
    %10 = arith.mulf %3, %3 : vector<16x8xf32>
    %cst_8 = arith.constant dense<0.000000e+00> : vector<8xf32>
    %11 = vector.multi_reduction <add>, %10, %cst_8 [0] : vector<16x8xf32> to vector<8xf32>
    %12 = vector.shape_cast %11 : vector<8xf32> to vector<1x8xf32>
    %13 = arith.addf %9, %12 : vector<1x8xf32>
    %c0_9 = arith.constant 0 : index
    %c0_10 = arith.constant 0 : index
    %14 = vector.load %arg5[%c0_9, %c0_10] : memref<1x8xf32, #tpu.memory_space<vmem>>, vector<1x8xf32>
    tpu.vector_store %arg5[%c0_9, %c0_10], %13 {strides = array<i32>} : memref<1x8xf32, #tpu.memory_space<vmem>>, vector<1x8xf32>,
    %c15_i32 = arith.constant 15 : i32
    %15 = arith.cmpi eq, %arg0, %c15_i32 : i32
    %16 = arith.extui %15 : i1 to i32
    %c0_i32_11 = arith.constant 0 : i32
    %17 = arith.cmpi ne, %16, %c0_i32_11 : i32
    scf.if %17 {
      %c0_12 = arith.constant 0 : index
      %c0_13 = arith.constant 0 : index
      %18 = vector.load %arg4[%c0_12, %c0_13] : memref<1x8xf32, #tpu.memory_space<vmem>>, vector<1x8xf32>
      %c0_14 = arith.constant 0 : index
      %c0_15 = arith.constant 0 : index
      %19 = vector.load %arg5[%c0_14, %c0_15] : memref<1x8xf32, #tpu.memory_space<vmem>>, vector<1x8xf32>
      %20 = vector.extract_strided_slice %18 {offsets = [0, 0], sizes = [1, 4], strides = [1, 1]} : vector<1x8xf32> to vector<1x4xf32>
      %21 = vector.extract_strided_slice %18 {offsets = [0, 4], sizes = [1, 4], strides = [1, 1]} : vector<1x8xf32> to vector<1x4xf32>
      %22 = arith.addf %20, %21 : vector<1x4xf32>
      %23 = vector.extract_strided_slice %19 {offsets = [0, 0], sizes = [1, 4], strides = [1, 1]} : vector<1x8xf32> to vector<1x4xf32>
      %24 = vector.extract_strided_slice %19 {offsets = [0, 4], sizes = [1, 4], strides = [1, 1]} : vector<1x8xf32> to vector<1x4xf32>
      %25 = arith.addf %23, %24 : vector<1x4xf32>
      %26 = vector.shape_cast %22 : vector<1x4xf32> to vector<1x1x4xf32>
      %c0_16 = arith.constant 0 : index
      %c0_17 = arith.constant 0 : index
      %c0_18 = arith.constant 0 : index
      %27 = vector.load %arg2[%c0_16, %c0_17, %c0_18] : memref<1x1x4xf32, #tpu.memory_space<vmem>>, vector<1x1x4xf32>
      tpu.vector_store %arg2[%c0_16, %c0_17, %c0_18], %26 {strides = array<i32>} : memref<1x1x4xf32, #tpu.memory_space<vmem>>, vector<1x1x4xf32>,
      %28 = vector.shape_cast %25 : vector<1x4xf32> to vector<1x1x4xf32>
      %c0_19 = arith.constant 0 : index
      %c0_20 = arith.constant 0 : index
      %c0_21 = arith.constant 0 : index
      %29 = vector.load %arg3[%c0_19, %c0_20, %c0_21] : memref<1x1x4xf32, #tpu.memory_space<vmem>>, vector<1x1x4xf32>
      tpu.vector_store %arg3[%c0_19, %c0_20, %c0_21], %28 {strides = array<i32>} : memref<1x1x4xf32, #tpu.memory_space<vmem>>, vector<1x1x4xf32>,
    } else {
    }
    return
  }
  func.func @transform_0(%arg0: i32) -> (i32, i32) {
    %c0_i32 = arith.constant 0 : i32
    %c0_i32_0 = arith.constant 0 : i32
    return %arg0, %c0_i32 : i32, i32
  }
  func.func @transform_1(%arg0: i32) -> (i32, i32, i32) {
    %c0_i32 = arith.constant 0 : i32
    %c0_i32_0 = arith.constant 0 : i32
    %c0_i32_1 = arith.constant 0 : i32
    %c0_i32_2 = arith.constant 0 : i32
    return %c0_i32, %c0_i32_0, %c0_i32_1 : i32, i32, i32
  }
  func.func @transform_2(%arg0: i32) -> (i32, i32, i32) {
    %c0_i32 = arith.constant 0 : i32
    %c0_i32_0 = arith.constant 0 : i32
    %c0_i32_1 = arith.constant 0 : i32
    %c0_i32_2 = arith.constant 0 : i32
    return %c0_i32, %c0_i32_0, %c0_i32_1 : i32, i32, i32
  }
}

</mosaic_0001>

<bundles_post_ra>
// kernel: tpu_custom_call.1
= control target key start
LH: loop header
LB: loop body
LE: loop exit
PB: predicated region body
PF: predicated region fallthrough
CT: control target
= control target key end

     0   :  { %8 = vsyncpa [#allocation5], 0  ;;  %s418_s0 = inlined_call_operand.vmem [shape: f32[256,8], index: 0, kind: input, shape index: {}]   ;;  %s419_s1 = inlined_call_operand.hbm [shape: f32[1,1,4], index: 1, kind: output, shape index: {0}]   ;;  %s420_s2 = inlined_call_operand.hbm [shape: f32[1,1,4], index: 2, kind: output, shape index: {1}]  }
   0x1   :  { %9 = vsyncpa [#allocation7], 0  ;;  %s376_s9 = smov 0  }
   0x2 LB: > { %s382_s10 = sadd.s32 4294967295, %s355_s9   ;;  %p258_p0 = scmp.ge.s32.totalorder %s355_s9, 1  ;;  %s355_s9 = sphi %s376_s9, %s15_s9  }
   0x3   : > { %p108_p1 = scmp.lt.s32.totalorder %s355_s9, 17 }
   0x5   : > { %p109_p2 = pnand %p258_p0, %p108_p1 }
   0x6   : > { %s259_s11 = sshll.u32 (!%p109_p2), %s382_s10, 1  ;;  %p261_p4 = scmp.ne.s32.totalorder (!%p109_p2), %s382_s10, 0 }
   0x7   : > { %112 = sbr.rel (%p109_p2) target bundleno = 195 (0xc3), region = 24  ;;  %p126_p3 = scmp.lt.s32.totalorder (!%p109_p2), %s259_s11, 31 }
   0xc   : > { %s422_s11 = smov (!%p126_p3, %s259_s11), 31  ;;  %134 = sbr.rel (%p261_p4) target bundleno = 19 (0x13), region = 28 }
   0xd   : > { %s260_s12 = sshll.u32 %s422_s11, 3 }
   0xe   : > { %s129_s15 = scalar_lea.vmem %s418_s0, %s260_s12 }
  0x11   : > { %vm135_vm0 = vcmask 57344   ;;  %v357_v0 = vmov 0.0  }
  0x12   : > { %136 = vst.msk [vmem:[#allocation2] sm:$0x1] %vm135_vm0, %v357_v0  ;;  %137 = vst.msk [vmem:[#allocation3] sm:$0x1] %vm135_vm0, %v357_v0 }
  0x13 PF: > { %v138_v1 = vld [vmem:[%s129_s15] sm:$0xff]  ;;  %v139_v2 = vld [vmem:[%s129_s15 + $0x8] sm:$0xff]  ;;  %vm141_vm1 = vcmask 64512   ;;  %vm152_vm2 = vcmask 57344   ;;  %p262_p5 = scmp.ne.s32.totalorder %s382_s10, 15 }
  0x14   : > { %v142_v3 = vsel %vm141_vm1, %v138_v1, 0.0  ;;  %v143_v4 = vsel %vm141_vm1, %v139_v2, 0.0  ;;  %v155_v5 = vmul.f32 %v138_v1, %v138_v1  ;;  %v156_v6 = vmul.f32 %v139_v2, %v139_v2  ;;  %s358_s16 = smov (!%p262_p5), 124  }
  0x15   : > { %v144_v7 = vadd.f32 %v143_v4, %v142_v3 }
  0x16   : > { %v157_v8 = vsel %vm141_vm1, %v155_v5, 0.0  ;;  %v158_v9 = vsel %vm141_vm1, %v156_v6, 0.0 }
  0x17   : > { %v145_v10 = vrot.slane %v144_v7, 4  ;;  %v159_v11 = vadd.f32 %v158_v9, %v157_v8 }
  0x19   : > { %v146_v12 = vadd.f32 %v145_v10, %v144_v7  ;;  %v160_v13 = vrot.slane %v159_v11, 4  ;;  %v140_v20 = vld [vmem:[#allocation2] sm:$0x1]  ;;  %v154_v23 = vld [vmem:[#allocation3] sm:$0x1] }
  0x1b   : > { %v147_v14 = vrot.slane %v146_v12, 2  ;;  %v161_v15 = vadd.f32 %v160_v13, %v159_v11 }
  0x1d   : > { %v148_v16 = vadd.f32 %v147_v14, %v146_v12  ;;  %v162_v17 = vrot.slane %v161_v15, 2 }
  0x1f   : > { %v149_v18 = vrot.slane %v148_v16, 1  ;;  %v163_v19 = vadd.f32 %v162_v17, %v161_v15 }
  0x21   : > { %v150_v21 = vadd.f32 %v149_v18, %v148_v16  ;;  %v164_v22 = vrot.slane %v163_v19, 1 }
  0x23   : > { %v151_v24 = vadd.f32 %v150_v21, %v140_v20  ;;  %v165_v25 = vadd.f32 %v164_v22, %v163_v19  ;;  %171 = sbr.rel (%p262_p5) target bundleno = 167 (0xa7), region = 32 }
  0x25   : > { %153 = vst.msk [vmem:[#allocation2] sm:$0x1] %vm152_vm2, %v151_v24  ;;  %v166_v26 = vadd.f32 %v165_v25, %v154_v23 }
  0x27   : > { %167 = vst.msk [vmem:[#allocation3] sm:$0x1] %vm152_vm2, %v166_v26 }
  0x28   : > { %vm184_vm3 = vcmask 24576  }
  0x2c   : > { %v172_v27 = vld [vmem:[#allocation2] sm:$0x1] }
  0x2d   : > { %175 = vrot.lane.b32.xlu0 %v172_v27, %s358_s16 }
  0x2e   : > { %v173_v28 = vld [vmem:[#allocation3] sm:$0x1] }
  0x31   : > { %180 = vrot.lane.b32.xlu0 %v173_v28, %s358_s16 }
  0x9f   : > { %v176_v29 = vpop.permute.xlu0 %175 }
  0xa0   : > { %v178_v30 = vadd.f32 %v176_v29, %v172_v27 }
  0xa2   : > { %185 = vst.msk [vmem:[#allocation4] sm:$0x1] %vm184_vm3, %v178_v30 }
  0xa3   : > { %v181_v31 = vpop.permute.xlu0 %180 }
  0xa4   : > { %v183_v32 = vadd.f32 %v181_v31, %v173_v28 }
  0xa6   : > { %186 = vst.msk [vmem:[#allocation6] sm:$0x1] %vm184_vm3, %v183_v32 }
  0xa7 PF: > { %p277_p6 = scmp.eq.s32.totalorder %s382_s10, 15  ;;  %s359_s17 = smov [#allocation4]  }
  0xa8   : > { %s194_s18 = sshll.u32 %s359_s17, 4  ;;  %s360_s19 = smov [#allocation6]   ;;  %s195_s18 = int_to_ptr.vmem [resolvable:$true] %s194_s18 }
  0xa9   : > { %s205_s20 = sshll.u32 %s360_s19, 4  ;;  %s293_s21 = scalar_lea.vmem %s195_s18, 16  ;;  %s206_s20 = int_to_ptr.vmem [resolvable:$true] %s205_s20 }
  0xaa   : > { %p294_p7 = scmp.ne.s32.totalorder %s195_s18, %s293_s21  ;;  %s299_s22 = scalar_lea.vmem %s195_s18, 32 }
  0xab   : > { %p300_p10 = scmp.lt.s32.totalorder %s195_s18, %s195_s18  ;;  %p301_p11 = scmp.lt.s32.totalorder %s299_s22, %s293_s21 }
  0xac   : > { %p295_p8 = pnand %p294_p7, %p277_p6 }
  0xad   : > { %p302_p12 = por %p301_p11, %p300_p10 }
  0xae   : > { %p296_p9 = pneg %p295_p8 }
  0xb0   : > { %p303_p13 = pnand %p302_p12, %p296_p9 }
  0xb2   : > { %306 = shalt.err (!%p303_p13)
}
  0xb3   : > { %270 = dma.vmem_to_hbm [thread:$0]  (%p277_p6), %s195_s18, 16, %s419_s1, [#allocation5]  }
  0xb4   : > { %s317_s25 = scalar_lea.vmem %s206_s20, 16  ;;  %s323_s26 = scalar_lea.vmem %s206_s20, 32 }
  0xb5   : > { %p318_p0 = scmp.ne.s32.totalorder %s206_s20, %s317_s25  ;;  %p324_p3 = scmp.lt.s32.totalorder %s206_s20, %s206_s20 }
  0xb6   : > { %p325_p4 = scmp.lt.s32.totalorder %s323_s26, %s317_s25 }
  0xb7   : > { %p319_p1 = pnand %p318_p0, %p277_p6 }
  0xb8   : > { %p326_p5 = por %p325_p4, %p324_p3 }
  0xb9   : > { %p320_p2 = pneg %p319_p1 }
  0xbb   : > { %p327_p7 = pnand %p326_p5, %p320_p2 }
  0xbd   : > { %330 = shalt.err (!%p327_p7)
}
  0xbe   : > { %272 = dma.vmem_to_hbm [thread:$0]  (%p277_p6), %s206_s20, 16, %s420_s2, [#allocation7]  }
  0xbf   : > { %346 = dma.done.wait (%p277_p6), [#allocation5], 16  }
  0xc0   : > { %348 = vsyncadd (%p277_p6), [#allocation5], 4294967280 }
  0xc1   : > { %350 = dma.done.wait (%p277_p6), [#allocation7], 16  }
  0xc2   : > { %352 = vsyncadd (%p277_p6), [#allocation7], 4294967280 }
  0xc3 PF: > { %s15_s9 = sadd.s32 1, %s355_s9  }
  0xc4   : > { %p12_p8 = scmp.ge.s32.totalorder %s15_s9, 18  }
  0xc6   :  { %14 = sbr.rel (!%p12_p8) target bundleno = 2 (0x2), region = 67 }
  0xcb   :  { %222 = vsyncpa [#allocation5], 1 }
  0xcc   :  { %224 = vsyncpa [#allocation5 + $0x1], 1 }
  0xcd   :  { %225 = vsyncpa [#allocation7], 1 }

</bundles_post_ra>
